<compile_context>
chip_gen: v7x
topology: tpu7x:2x2x1
jax: 0.10.0
libtpu: 0.0.40
codegen_flags: <defaults>
</compile_context>

<pallas_src>
import functools

import jax
import jax.numpy as jnp
from jax import lax
from jax.experimental import pallas as pl
from jax.experimental.pallas import tpu as pltpu

EPS = 1e-5  # BatchNorm1d default


def convnet_kernel(x_ref, w_ref, g_ref, bt_ref, o_ref,
                   sum_ref, sumsq_ref, max_ref, *, K, TL, inv_count):
    """One (Cout-tile, L-tile) grid step.

    x_ref : (N, TL+K-1, Cin)  bf16  halo tile of channels-last padded input
    w_ref : (K, Cin, TC)      bf16  sign(gamma)-folded conv weights for this Cout tile
    g_ref : (1, TC)           f32   |gamma|
    bt_ref: (1, TC)           f32   beta
    o_ref : (N, TC)           f32   max over length of BN(conv)
    scratch (persist across the sequential L axis):
      sum_ref, sumsq_ref : (1, TC) f32 per-channel running sum / sum-of-squares
      max_ref            : (N, TC) f32 per-(n, channel) running max of conv
    """
    li = pl.program_id(1)

    @pl.when(li == 0)
    def _init():
        sum_ref[...] = jnp.zeros_like(sum_ref)
        sumsq_ref[...] = jnp.zeros_like(sumsq_ref)
        max_ref[...] = jnp.full_like(max_ref, -jnp.inf)

    x = x_ref[...]                                   # (N, TL+K-1, Cin) bf16
    w = w_ref[...]                                   # (K, Cin, TC)     bf16
    n = x.shape[0]
    cin = x.shape[2]

    # conv[n, l, c] = sum_k sum_ci x[n, l+k, ci] * w[k, ci, c]; K shifted MXU dots,
    # f32 accumulation.  Sublane-shifted slices go to the XLU, which has slack.
    conv = jnp.dot(x[:, 0:TL, :].reshape(n * TL, cin), w[0],
                   preferred_element_type=jnp.float32)            # (N*TL, TC) f32
    for k in range(1, K):
        conv += jnp.dot(x[:, k:k + TL, :].reshape(n * TL, cin), w[k],
                        preferred_element_type=jnp.float32)

    # Streaming BN statistics + per-(n, c) running max; the (N, L, Cout) conv/BN
    # intermediate never materializes in HBM.
    sum_ref[...] += jnp.sum(conv, axis=0, keepdims=True)
    sumsq_ref[...] += jnp.sum(conv * conv, axis=0, keepdims=True)

    conv3 = conv.reshape(n, TL, -1)                  # split on a sublane boundary
    max_ref[...] = jnp.maximum(max_ref[...], jnp.max(conv3, axis=1))

    @pl.when(li == pl.num_programs(1) - 1)
    def _finalize():
        mean = sum_ref[...] * inv_count                           # (1, TC)
        var = jnp.maximum(sumsq_ref[...] * inv_count - mean * mean, 0.0)
        scale = g_ref[...] * lax.rsqrt(var + EPS)                 # >= 0 (sign folded into w)
        shift = bt_ref[...] - mean * scale
        # BN is a per-channel affine with non-negative scale, so
        # max_l(scale*conv+shift) == scale*max_l(conv) + shift.
        o_ref[...] = max_ref[...] * scale + shift


def _round_up(x, m):
    return ((x + m - 1) // m) * m


def _pick_c_tile(cout_pad):
    """Lane-dense Cout tile; >=2 parallel tiles once Cout_pad >= 256 (v7x 2 TCs)."""
    if cout_pad <= 128:
        return cout_pad
    if cout_pad % 256 == 0 and cout_pad > 256:
        return 256
    return 128


def _pick_l_tile(l_out, n, k, tc, budget_bytes=20 << 20, cap=1024):
    """Largest divisor of l_out whose working set fits the VMEM budget.

    Accounts for the 128-lane padding of the Cin dim and the 8-sublane padding of
    the halo tile, the input double-buffer, and the f32 conv-tile temporaries.
    """
    def tile_bytes(tl):
        tlh = _round_up(tl + k - 1, 8)
        x_b = 2 * n * tlh * 128 * 2          # double-buffered bf16 halo tile (lane-padded)
        tmp_b = 2 * n * tl * tc * 4          # f32 conv tile + one elementwise temporary
        return x_b + tmp_b

    max_tl = cap
    while max_tl > 8 and tile_bytes(max_tl) > budget_bytes:
        max_tl //= 2
    hi = min(max_tl, l_out)
    for t in range(hi - (hi % 8), 0, -8):    # prefer multiples of 8 (clean layout)
        if t > 0 and l_out % t == 0:
            return t
    for t in range(hi, 0, -1):
        if l_out % t == 0:
            return t
    # TODO(synk): masked/ragged L tiles for prime L that exceeds the VMEM budget.
    return l_out


def convnet_forward(x, weight, bias, gamma, beta, *, padding=2):
    """x: (N, Cin, L) (PyTorch NCL). weight: (Cout, Cin, K). Returns (N, Cout) f32.

    Conv bias is not sent to the kernel: training-mode BatchNorm subtracts it back
    out via the batch mean (numerically identical).
    """
    del bias
    N, Cin, L = x.shape
    Cout, _, K = weight.shape
    L_out = L + 2 * padding - K + 1
    assert L_out >= 1

    # ---- wrapper-side parameter prep (tiny) ----
    # Fold sign(gamma) into the weight columns so the BN scale is always >= 0.
    sgn = jnp.where(gamma < 0, -1.0, 1.0).astype(jnp.float32)
    Cout_pad = _round_up(Cout, 128)
    w_kic = jnp.transpose(weight.astype(jnp.float32) * sgn[:, None, None], (2, 1, 0))
    w_kic = jnp.pad(w_kic, ((0, 0), (0, 0), (0, Cout_pad - Cout))).astype(jnp.bfloat16)
    g2 = jnp.pad(jnp.abs(gamma).astype(jnp.float32), (0, Cout_pad - Cout)).reshape(1, Cout_pad)
    bt2 = jnp.pad(beta.astype(jnp.float32), (0, Cout_pad - Cout)).reshape(1, Cout_pad)

    # ---- wrapper-side x layout glue, built directly in bf16 (no f32 expansion) ----
    x_nlc = jnp.transpose(x, (0, 2, 1)).astype(jnp.bfloat16)            # (N, L, Cin)
    x_pad = jnp.pad(x_nlc, ((0, 0), (padding, padding), (0, 0)))        # (N, L+2p, Cin)

    TC = _pick_c_tile(Cout_pad)
    TL = _pick_l_tile(L_out, N, K, TC)
    nL = L_out // TL
    TLH = TL + K - 1

    # Overlapping halo tiles: only (K-1)/TL extra bytes vs the raw input, instead of
    # the K-fold im2col duplication.
    x_tiles = jnp.stack([x_pad[:, t * TL: t * TL + TLH, :] for t in range(nL)], axis=0)

    kernel = functools.partial(convnet_kernel, K=K, TL=TL,
                               inv_count=1.0 / float(N * L_out))

    out = pl.pallas_call(
        kernel,
        out_shape=jax.ShapeDtypeStruct((N, Cout_pad), jnp.float32),
        grid_spec=pltpu.PrefetchScalarGridSpec(
            num_scalar_prefetch=0,
            grid=(Cout_pad // TC, nL),           # (parallel Cout tiles, sequential L tiles)
            in_specs=[
                pl.BlockSpec((None, N, TLH, Cin), lambda c, l: (l, 0, 0, 0)),  # halo tile
                pl.BlockSpec((K, Cin, TC), lambda c, l: (0, 0, c)),            # conv weights
                pl.BlockSpec((1, TC), lambda c, l: (0, c)),                    # |gamma|
                pl.BlockSpec((1, TC), lambda c, l: (0, c)),                    # beta
            ],
            out_specs=pl.BlockSpec((N, TC), lambda c, l: (0, c)),
            scratch_shapes=[
                pltpu.VMEM((1, TC), jnp.float32),   # per-channel sum
                pltpu.VMEM((1, TC), jnp.float32),   # per-channel sum of squares
                pltpu.VMEM((N, TC), jnp.float32),   # per-(n, c) running max of conv
            ],
        ),
        compiler_params=pltpu.CompilerParams(
            dimension_semantics=("parallel", "arbitrary"),
            vmem_limit_bytes=32 * 1024 * 1024,      # <= default scoped VMEM on v6e/v7x
        ),
    )(x_tiles, w_kic, g2, bt2)
    return out[:, :Cout]


def convnet_reference(x, weight, bias, gamma, beta, *, padding=2):
    """Plain-JAX reference mirroring PyTorch forward (training-mode BN, with bias)."""
    conv = lax.conv_general_dilated(
        x.astype(jnp.float32), weight.astype(jnp.float32),
        window_strides=(1,), padding=[(padding, padding)],
        dimension_numbers=("NCH", "OIH", "NCH"))
    conv = conv + bias[None, :, None]
    mean = jnp.mean(conv, axis=(0, 2), keepdims=True)
    var = jnp.mean((conv - mean) ** 2, axis=(0, 2), keepdims=True)
    y = (conv - mean) / jnp.sqrt(var + EPS)
    y = y * gamma[None, :, None] + beta[None, :, None]
    return jnp.max(y, axis=2)


if __name__ == "__main__":
    # Shapes consistent with Conv1d(Cin, Cout, kernel_size=5, stride=1, padding=2)
    N, Cin, Cout, L, K, PAD = 2, 4, 8, 16, 5, 2

    key = jax.random.PRNGKey(0)
    kx, kw, kb, kg, kb2 = jax.random.split(key, 5)
    x = jax.random.normal(kx, (N, Cin, L), dtype=jnp.float32)           # PyTorch NCL
    bound = 1.0 / (Cin * K) ** 0.5                                      # Conv1d default init
    weight = jax.random.uniform(kw, (Cout, Cin, K), jnp.float32, -bound, bound)
    bias = jax.random.uniform(kb, (Cout,), jnp.float32, -bound, bound)

    # Test 1: default BatchNorm init (gamma=1, beta=0), as in the PyTorch module.
    gamma = jnp.ones((Cout,), jnp.float32)
    beta = jnp.zeros((Cout,), jnp.float32)
    out = jax.block_until_ready(convnet_forward(x, weight, bias, gamma, beta, padding=PAD))
    ref = convnet_reference(x, weight, bias, gamma, beta, padding=PAD)
    assert out.shape == (N, Cout)
    # bf16 matmul operands -> loosened tolerance vs the f32 reference.
    assert jnp.allclose(out, ref, atol=3e-2, rtol=3e-2), "mismatch (default BN params)"

    # Test 2: mixed-sign gamma exercises the sign(gamma) weight folding.
    gamma2 = jax.random.normal(kg, (Cout,), jnp.float32)
    beta2 = jax.random.normal(kb2, (Cout,), jnp.float32)
    out2 = jax.block_until_ready(convnet_forward(x, weight, bias, gamma2, beta2, padding=PAD))
    ref2 = convnet_reference(x, weight, bias, gamma2, beta2, padding=PAD)
    assert jnp.allclose(out2, ref2, atol=3e-2, rtol=3e-2), "mismatch (mixed-sign gamma)"

    print("KERNEL_OK")
</pallas_src>

<mosaic_0001>
module attributes {stable_mosaic.version = 11 : i64} {
  func.func @convnet_kernel(%arg0: i32, %arg1: i32, %arg2: memref<1x2x20x4xbf16, #tpu.memory_space<vmem>>, %arg3: memref<5x4x128xbf16, #tpu.memory_space<vmem>>, %arg4: memref<1x128xf32, #tpu.memory_space<vmem>>, %arg5: memref<1x128xf32, #tpu.memory_space<vmem>>, %arg6: memref<2x128xf32, #tpu.memory_space<vmem>>, %arg7: memref<1x128xf32, #tpu.memory_space<vmem>>, %arg8: memref<1x128xf32, #tpu.memory_space<vmem>>, %arg9: memref<2x128xf32, #tpu.memory_space<vmem>>) attributes {dimension_semantics = [#tpu.dimension_semantics<parallel>, #tpu.dimension_semantics<arbitrary>], iteration_bounds = array<i64: 1, 1>, scalar_prefetch = 0 : i64, scratch_operands = 3 : i64, tpu.core_type = #tpu.core_type<tc>, window_params = [{transform_indices = @transform_0, window_bounds = array<i64: 1, 2, 20, 4>}, {transform_indices = @transform_1, window_bounds = array<i64: 5, 4, 128>}, {transform_indices = @transform_2, window_bounds = array<i64: 1, 128>}, {transform_indices = @transform_3, window_bounds = array<i64: 1, 128>}, {transform_indices = @transform_4, window_bounds = array<i64: 2, 128>}]} {
    %c0_i32 = arith.constant 0 : i32
    %0 = arith.cmpi eq, %arg1, %c0_i32 : i32
    %1 = arith.extui %0 : i1 to i32
    %c0_i32_0 = arith.constant 0 : i32
    %2 = arith.cmpi ne, %1, %c0_i32_0 : i32
    scf.if %2 {
      %cst_28 = arith.constant 0.000000e+00 : f32
      %54 = vector.broadcast %cst_28 : f32 to vector<1x128xf32>
      %c0_29 = arith.constant 0 : index
      %c0_30 = arith.constant 0 : index
      %55 = vector.load %arg7[%c0_29, %c0_30] : memref<1x128xf32, #tpu.memory_space<vmem>>, vector<1x128xf32>
      tpu.vector_store %arg7[%c0_29, %c0_30], %54 {strides = array<i32>} : memref<1x128xf32, #tpu.memory_space<vmem>>, vector<1x128xf32>,
      %cst_31 = arith.constant 0.000000e+00 : f32
      %56 = vector.broadcast %cst_31 : f32 to vector<1x128xf32>
      %c0_32 = arith.constant 0 : index
      %c0_33 = arith.constant 0 : index
      %57 = vector.load %arg8[%c0_32, %c0_33] : memref<1x128xf32, #tpu.memory_space<vmem>>, vector<1x128xf32>
      tpu.vector_store %arg8[%c0_32, %c0_33], %56 {strides = array<i32>} : memref<1x128xf32, #tpu.memory_space<vmem>>, vector<1x128xf32>,
      %cst_34 = arith.constant 0xFF800000 : f32
      %58 = vector.broadcast %cst_34 : f32 to vector<2x128xf32>
      %c0_35 = arith.constant 0 : index
      %c0_36 = arith.constant 0 : index
      %59 = vector.load %arg9[%c0_35, %c0_36] : memref<2x128xf32, #tpu.memory_space<vmem>>, vector<2x128xf32>
      tpu.vector_store %arg9[%c0_35, %c0_36], %58 {strides = array<i32>} : memref<2x128xf32, #tpu.memory_space<vmem>>, vector<2x128xf32>,
    } else {
    }
    %c0 = arith.constant 0 : index
    %c0_1 = arith.constant 0 : index
    %c0_2 = arith.constant 0 : index
    %c0_3 = arith.constant 0 : index
    %3 = vector.load %arg2[%c0, %c0_1, %c0_2, %c0_3] : memref<1x2x20x4xbf16, #tpu.memory_space<vmem>>, vector<1x2x20x4xbf16>
    %4 = vector.shape_cast %3 : vector<1x2x20x4xbf16> to vector<2x20x4xbf16>
    %c0_4 = arith.constant 0 : index
    %c0_5 = arith.constant 0 : index
    %c0_6 = arith.constant 0 : index
    %5 = vector.load %arg3[%c0_4, %c0_5, %c0_6] : memref<5x4x128xbf16, #tpu.memory_space<vmem>>, vector<5x4x128xbf16>
    %6 = vector.extract_strided_slice %4 {offsets = [0, 0, 0], sizes = [2, 16, 4], strides = [1, 1, 1]} : vector<2x20x4xbf16> to vector<2x16x4xbf16>
    %7 = vector.shape_cast %6 : vector<2x16x4xbf16> to vector<32x4xbf16>
    %8 = vector.extract_strided_slice %5 {offsets = [0, 0, 0], sizes = [1, 4, 128], strides = [1, 1, 1]} : vector<5x4x128xbf16> to vector<1x4x128xbf16>
    %9 = vector.shape_cast %8 : vector<1x4x128xbf16> to vector<4x128xbf16>
    %cst = arith.constant dense<0.000000e+00> : vector<32x128xf32>
    %10 = tpu.matmul %7, %9, %cst {dimension_numbers = #tpu.dot_dimension_numbers<[1], [0], [0], [1], [0, 0, 1, 1], [], []>} : vector<32x4xbf16>, vector<4x128xbf16>, vector<32x128xf32> -> vector<32x128xf32>
    %11 = vector.extract_strided_slice %4 {offsets = [0, 1, 0], sizes = [2, 16, 4], strides = [1, 1, 1]} : vector<2x20x4xbf16> to vector<2x16x4xbf16>
    %12 = vector.shape_cast %11 : vector<2x16x4xbf16> to vector<32x4xbf16>
    %13 = vector.extract_strided_slice %5 {offsets = [1, 0, 0], sizes = [1, 4, 128], strides = [1, 1, 1]} : vector<5x4x128xbf16> to vector<1x4x128xbf16>
    %14 = vector.shape_cast %13 : vector<1x4x128xbf16> to vector<4x128xbf16>
    %cst_7 = arith.constant dense<0.000000e+00> : vector<32x128xf32>
    %15 = tpu.matmul %12, %14, %cst_7 {dimension_numbers = #tpu.dot_dimension_numbers<[1], [0], [0], [1], [0, 0, 1, 1], [], []>} : vector<32x4xbf16>, vector<4x128xbf16>, vector<32x128xf32> -> vector<32x128xf32>
    %16 = arith.addf %10, %15 : vector<32x128xf32>
    %17 = vector.extract_strided_slice %4 {offsets = [0, 2, 0], sizes = [2, 16, 4], strides = [1, 1, 1]} : vector<2x20x4xbf16> to vector<2x16x4xbf16>
    %18 = vector.shape_cast %17 : vector<2x16x4xbf16> to vector<32x4xbf16>
    %19 = vector.extract_strided_slice %5 {offsets = [2, 0, 0], sizes = [1, 4, 128], strides = [1, 1, 1]} : vector<5x4x128xbf16> to vector<1x4x128xbf16>
    %20 = vector.shape_cast %19 : vector<1x4x128xbf16> to vector<4x128xbf16>
    %cst_8 = arith.constant dense<0.000000e+00> : vector<32x128xf32>
    %21 = tpu.matmul %18, %20, %cst_8 {dimension_numbers = #tpu.dot_dimension_numbers<[1], [0], [0], [1], [0, 0, 1, 1], [], []>} : vector<32x4xbf16>, vector<4x128xbf16>, vector<32x128xf32> -> vector<32x128xf32>
    %22 = arith.addf %16, %21 : vector<32x128xf32>
    %23 = vector.extract_strided_slice %4 {offsets = [0, 3, 0], sizes = [2, 16, 4], strides = [1, 1, 1]} : vector<2x20x4xbf16> to vector<2x16x4xbf16>
    %24 = vector.shape_cast %23 : vector<2x16x4xbf16> to vector<32x4xbf16>
    %25 = vector.extract_strided_slice %5 {offsets = [3, 0, 0], sizes = [1, 4, 128], strides = [1, 1, 1]} : vector<5x4x128xbf16> to vector<1x4x128xbf16>
    %26 = vector.shape_cast %25 : vector<1x4x128xbf16> to vector<4x128xbf16>
    %cst_9 = arith.constant dense<0.000000e+00> : vector<32x128xf32>
    %27 = tpu.matmul %24, %26, %cst_9 {dimension_numbers = #tpu.dot_dimension_numbers<[1], [0], [0], [1], [0, 0, 1, 1], [], []>} : vector<32x4xbf16>, vector<4x128xbf16>, vector<32x128xf32> -> vector<32x128xf32>
    %28 = arith.addf %22, %27 : vector<32x128xf32>
    %29 = vector.extract_strided_slice %4 {offsets = [0, 4, 0], sizes = [2, 16, 4], strides = [1, 1, 1]} : vector<2x20x4xbf16> to vector<2x16x4xbf16>
    %30 = vector.shape_cast %29 : vector<2x16x4xbf16> to vector<32x4xbf16>
    %31 = vector.extract_strided_slice %5 {offsets = [4, 0, 0], sizes = [1, 4, 128], strides = [1, 1, 1]} : vector<5x4x128xbf16> to vector<1x4x128xbf16>
    %32 = vector.shape_cast %31 : vector<1x4x128xbf16> to vector<4x128xbf16>
    %cst_10 = arith.constant dense<0.000000e+00> : vector<32x128xf32>
    %33 = tpu.matmul %30, %32, %cst_10 {dimension_numbers = #tpu.dot_dimension_numbers<[1], [0], [0], [1], [0, 0, 1, 1], [], []>} : vector<32x4xbf16>, vector<4x128xbf16>, vector<32x128xf32> -> vector<32x128xf32>
    %34 = arith.addf %28, %33 : vector<32x128xf32>
    %c0_11 = arith.constant 0 : index
    %c0_12 = arith.constant 0 : index
    %35 = vector.load %arg7[%c0_11, %c0_12] : memref<1x128xf32, #tpu.memory_space<vmem>>, vector<1x128xf32>
    %cst_13 = arith.constant dense<0.000000e+00> : vector<128xf32>
    %36 = vector.multi_reduction <add>, %34, %cst_13 [0] : vector<32x128xf32> to vector<128xf32>
    %37 = vector.shape_cast %36 : vector<128xf32> to vector<1x128xf32>
    %38 = arith.addf %35, %37 : vector<1x128xf32>
    %c0_14 = arith.constant 0 : index
    %c0_15 = arith.constant 0 : index
    %39 = vector.load %arg7[%c0_14, %c0_15] : memref<1x128xf32, #tpu.memory_space<vmem>>, vector<1x128xf32>
    tpu.vector_store %arg7[%c0_14, %c0_15], %38 {strides = array<i32>} : memref<1x128xf32, #tpu.memory_space<vmem>>, vector<1x128xf32>,
    %c0_16 = arith.constant 0 : index
    %c0_17 = arith.constant 0 : index
    %40 = vector.load %arg8[%c0_16, %c0_17] : memref<1x128xf32, #tpu.memory_space<vmem>>, vector<1x128xf32>
    %41 = arith.mulf %34, %34 : vector<32x128xf32>
    %cst_18 = arith.constant dense<0.000000e+00> : vector<128xf32>
    %42 = vector.multi_reduction <add>, %41, %cst_18 [0] : vector<32x128xf32> to vector<128xf32>
    %43 = vector.shape_cast %42 : vector<128xf32> to vector<1x128xf32>
    %44 = arith.addf %40, %43 : vector<1x128xf32>
    %c0_19 = arith.constant 0 : index
    %c0_20 = arith.constant 0 : index
    %45 = vector.load %arg8[%c0_19, %c0_20] : memref<1x128xf32, #tpu.memory_space<vmem>>, vector<1x128xf32>
    tpu.vector_store %arg8[%c0_19, %c0_20], %44 {strides = array<i32>} : memref<1x128xf32, #tpu.memory_space<vmem>>, vector<1x128xf32>,
    %46 = vector.shape_cast %34 : vector<32x128xf32> to vector<2x16x128xf32>
    %c0_21 = arith.constant 0 : index
    %c0_22 = arith.constant 0 : index
    %47 = vector.load %arg9[%c0_21, %c0_22] : memref<2x128xf32, #tpu.memory_space<vmem>>, vector<2x128xf32>
    %cst_23 = arith.constant dense<0xFF800000> : vector<2x128xf32>
    %48 = vector.multi_reduction <maximumf>, %46, %cst_23 [1] : vector<2x16x128xf32> to vector<2x128xf32>
    %49 = arith.maximumf %47, %48 : vector<2x128xf32>
    %c0_24 = arith.constant 0 : index
    %c0_25 = arith.constant 0 : index
    %50 = vector.load %arg9[%c0_24, %c0_25] : memref<2x128xf32, #tpu.memory_space<vmem>>, vector<2x128xf32>
    tpu.vector_store %arg9[%c0_24, %c0_25], %49 {strides = array<i32>} : memref<2x128xf32, #tpu.memory_space<vmem>>, vector<2x128xf32>,
    %c0_i32_26 = arith.constant 0 : i32
    %51 = arith.cmpi eq, %arg1, %c0_i32_26 : i32
    %52 = arith.extui %51 : i1 to i32
    %c0_i32_27 = arith.constant 0 : i32
    %53 = arith.cmpi ne, %52, %c0_i32_27 : i32
    scf.if %53 {
      %c0_28 = arith.constant 0 : index
      %c0_29 = arith.constant 0 : index
      %54 = vector.load %arg7[%c0_28, %c0_29] : memref<1x128xf32, #tpu.memory_space<vmem>>, vector<1x128xf32>
      %cst_30 = arith.constant 3.125000e-02 : f32
      %55 = vector.broadcast %cst_30 : f32 to vector<1x128xf32>
      %56 = arith.mulf %54, %55 : vector<1x128xf32>
      %c0_31 = arith.constant 0 : index
      %c0_32 = arith.constant 0 : index
      %57 = vector.load %arg8[%c0_31, %c0_32] : memref<1x128xf32, #tpu.memory_space<vmem>>, vector<1x128xf32>
      %cst_33 = arith.constant 3.125000e-02 : f32
      %58 = vector.broadcast %cst_33 : f32 to vector<1x128xf32>
      %59 = arith.mulf %57, %58 : vector<1x128xf32>
      %60 = arith.mulf %56, %56 : vector<1x128xf32>
      %61 = arith.subf %59, %60 : vector<1x128xf32>
      %cst_34 = arith.constant 0.000000e+00 : f32
      %62 = vector.broadcast %cst_34 : f32 to vector<1x128xf32>
      %63 = arith.maximumf %61, %62 : vector<1x128xf32>
      %c0_35 = arith.constant 0 : index
      %c0_36 = arith.constant 0 : index
      %64 = vector.load %arg4[%c0_35, %c0_36] : memref<1x128xf32, #tpu.memory_space<vmem>>, vector<1x128xf32>
      %cst_37 = arith.constant 9.99999974E-6 : f32
      %65 = vector.broadcast %cst_37 : f32 to vector<1x128xf32>
      %66 = arith.addf %63, %65 : vector<1x128xf32>
      %67 = math.rsqrt %66 : vector<1x128xf32>
      %68 = arith.mulf %64, %67 : vector<1x128xf32>
      %c0_38 = arith.constant 0 : index
      %c0_39 = arith.constant 0 : index
      %69 = vector.load %arg5[%c0_38, %c0_39] : memref<1x128xf32, #tpu.memory_space<vmem>>, vector<1x128xf32>
      %70 = arith.mulf %56, %68 : vector<1x128xf32>
      %71 = arith.subf %69, %70 : vector<1x128xf32>
      %c0_40 = arith.constant 0 : index
      %c0_41 = arith.constant 0 : index
      %72 = vector.load %arg9[%c0_40, %c0_41] : memref<2x128xf32, #tpu.memory_space<vmem>>, vector<2x128xf32>
      %73 = vector.broadcast %68 : vector<1x128xf32> to vector<2x128xf32>
      %74 = arith.mulf %72, %73 : vector<2x128xf32>
      %75 = vector.broadcast %71 : vector<1x128xf32> to vector<2x128xf32>
      %76 = arith.addf %74, %75 : vector<2x128xf32>
      %c0_42 = arith.constant 0 : index
      %c0_43 = arith.constant 0 : index
      %77 = vector.load %arg6[%c0_42, %c0_43] : memref<2x128xf32, #tpu.memory_space<vmem>>, vector<2x128xf32>
      tpu.vector_store %arg6[%c0_42, %c0_43], %76 {strides = array<i32>} : memref<2x128xf32, #tpu.memory_space<vmem>>, vector<2x128xf32>,
    } else {
    }
    return
  }
  func.func @transform_0(%arg0: i32, %arg1: i32) -> (i32, i32, i32, i32) {
    %c0_i32 = arith.constant 0 : i32
    %c0_i32_0 = arith.constant 0 : i32
    %c0_i32_1 = arith.constant 0 : i32
    %c0_i32_2 = arith.constant 0 : i32
    return %arg1, %c0_i32, %c0_i32_0, %c0_i32_1 : i32, i32, i32, i32
  }
  func.func @transform_1(%arg0: i32, %arg1: i32) -> (i32, i32, i32) {
    %c0_i32 = arith.constant 0 : i32
    %c0_i32_0 = arith.constant 0 : i32
    %c0_i32_1 = arith.constant 0 : i32
    return %c0_i32, %c0_i32_0, %arg0 : i32, i32, i32
  }
  func.func @transform_2(%arg0: i32, %arg1: i32) -> (i32, i32) {
    %c0_i32 = arith.constant 0 : i32
    %c0_i32_0 = arith.constant 0 : i32
    return %c0_i32, %arg0 : i32, i32
  }
  func.func @transform_3(%arg0: i32, %arg1: i32) -> (i32, i32) {
    %c0_i32 = arith.constant 0 : i32
    %c0_i32_0 = arith.constant 0 : i32
    return %c0_i32, %arg0 : i32, i32
  }
  func.func @transform_4(%arg0: i32, %arg1: i32) -> (i32, i32) {
    %c0_i32 = arith.constant 0 : i32
    %c0_i32_0 = arith.constant 0 : i32
    return %c0_i32, %arg0 : i32, i32
  }
}

</mosaic_0001>

<bundles_post_ra>
// kernel: tpu_custom_call.1
= control target key start
LH: loop header
LB: loop body
LE: loop exit
PB: predicated region body
PF: predicated region fallthrough
CT: control target
= control target key end

     0   :  { %vm101_vm0 = vcmask 1041408   ;;  %vm94_vm1 = vcmask 31744   ;;  %vm224_vm2 = vcmask 1042432   ;;  %vm225_vm3 = vcmask 1046532   ;;  %s916_s0 = inlined_call_operand.vmem [shape: bf16[1,2,20,4], index: 0, kind: input, shape index: {}]   ;;  %s917_s1 = inlined_call_operand.vmem [shape: bf16[5,4,128], index: 1, kind: input, shape index: {}]   ;;  %s918_s2 = inlined_call_operand.vmem [shape: f32[1,128], index: 2, kind: input, shape index: {}]   ;;  %s919_s3 = inlined_call_operand.vmem [shape: f32[1,128], index: 3, kind: input, shape index: {}]   ;;  %s920_s4 = inlined_call_operand.hbm [shape: f32[2,128], index: 4, kind: output, shape index: {}]  }
   0x1   :  { %v34_v0 = vld [vmem:[%s917_s1 + $0x4] sm:$0x3]  ;;  %v747_v1 = vld [vmem:[%s916_s0] sm:$0xf]  ;;  %v759_v4 = vld [vmem:[%s916_s0 + $0x8] sm:$0x3] }
   0x2   :  { %679 = vmatprep.subr.msk.bf16.mxu0 %vm101_vm0, %v34_v0  ;;  %v254_v2 = vsel %vm101_vm0, %v34_v0, 0  ;;  %v754_v3 = vld [vmem:[%s916_s0 + $0x4] sm:$0xf]  ;;  %v600_v5 = vrot.slane %v747_v1, 9  ;;  %v232_v7 = vrot.slane %v759_v4, 5  ;;  %vm767_vm4 = vmor %vm224_vm2, %vm225_vm3  ;;  %v321_v10 = vshrl.u32 %v759_v4, 16 }
   0x3   :  { %644 = vmatpush3.bf16.msra.mxu0 %v254_v2  ;;  %v229_v6 = vrot.slane %v754_v3, 5  ;;  %v35_v8 = vld [vmem:[%s917_s1 + $0x6] sm:$0x3]  ;;  %v33_v11 = vld [vmem:[%s917_s1 + $0x2] sm:$0x3]  ;;  %v41_v23 = vshrl.u32 %v747_v1, 16 }
   0x4   :  { %680 = vmatprep.subr.msk.bf16.mxu0 %vm101_vm0, %v35_v8  ;;  %v779_v12 = vld [vmem:[%s916_s0 + $0xc] sm:$0xf]  ;;  %v355_v13 = vsel %vm101_vm0, %v35_v8, 0  ;;  %677 = vmatprep.subr.msk.bf16.mxu1 %vm101_vm0, %v33_v11  ;;  %v788_v16 = vld [vmem:[%s916_s0 + $0x10] sm:$0xf]  ;;  %v103_v21 = vsel %vm101_vm0, %v33_v11, 0 }
   0x5   :  { %v230_v14 = vsel %vm767_vm4, %v600_v5, %v229_v6  ;;  %v231_v15 = vrot.slane %v229_v6, 4  ;;  %v793_v17 = vld [vmem:[%s916_s0 + $0x14] sm:$0x3]  ;;  %v601_v18 = vrot.slane %v779_v12, 9  ;;  %v236_v19 = vrot.slane %v788_v16, 5  ;;  %632 = vmatpush3.bf16.msra.mxu1 %v103_v21 }
   0x6   :  { %v239_v20 = vrot.slane %v793_v17, 5  ;;  %vm37_vm5 = vsmask.f32 3328  ;;  %vm38_vm6 = vsmask.f32 7440  ;;  %v44_v24 = vshll.u32 %v747_v1, 16 }
   0x7   :  { %v233_v22 = vsel %vm767_vm4, %v231_v15, %v232_v7  ;;  %v806_v25 = vld [vmem:[%s917_s1] sm:$0x3]  ;;  %v237_v27 = vsel %vm767_vm4, %v601_v18, %v236_v19  ;;  %v238_v28 = vrot.slane %v236_v19, 4  ;;  %v50_v29 = vshll.u32 %v754_v3, 16 }
   0x8   :  { %v602_v26 = vcombine.low %v230_v14, %v233_v22  ;;  %678 = vmatprep.subr.msk.bf16.mxu1 %vm101_vm0, %v806_v25  ;;  %v43_v30 = vrot.slane %v41_v23, 4  ;;  %v46_v31 = vrot.slane %v44_v24, 5  ;;  %v54_v32 = vshrl.u32 %v754_v3, 16 }
   0x9   :  { %v60_v33 = vshll.u32 %v759_v4, 16 }
   0xa   :  { %9 = vsyncpa [#allocation6], 0  ;;  %645 = vmatprep.mubr.msk.bf16.mxu0 %vm94_vm1, %v602_v26  ;;  %v240_v34 = vsel %vm767_vm4, %v238_v28, %v239_v20  ;;  %v52_v35 = vrot.slane %v50_v29, 5  ;;  %v312_v36 = vrot.slane %v41_v23, 5  ;;  %v596_v37 = vcombine.low %v747_v1, %v754_v3  ;;  %v830_v47 = vld [vmem:[%s917_s1 + $0x8] sm:$0x3] }
   0xb   :  { %v603_v38 = vcombine.low %v237_v27, %v240_v34  ;;  %v47_v39 = vor.u32 %v46_v31, %v43_v30  ;;  %v56_v40 = vrot.slane %v54_v32, 4  ;;  %v313_v41 = vrot.slane %v44_v24, 6  ;;  %vm822_vm7 = vmor %vm37_vm5, %vm38_vm6  ;;  %s715_s13 = smov [#allocation5]  }
   0xc   :  { %v62_v43 = vrot.slane %v60_v33, 5  ;;  %v316_v44 = vrot.slane %v54_v32, 5  ;;  %v317_v45 = vrot.slane %v50_v29, 6  ;;  %v65_v46 = vshrl.u32 %v779_v12, 16  ;;  %s584_s14 = sshll.u32 %s715_s13, 4  ;;  %s585_s14 = int_to_ptr.vmem [resolvable:$true] %s584_s14 }
   0xd   :  { %646 = vmatmul.mubr.msk.bf16.vlgmr.msra.gmra.mrb[0].mxu0 %vm94_vm1, %v603_v38  ;;  %v48_v48 = vrot.slane %v47_v39, 4  ;;  %v57_v49 = vor.u32 %v56_v40, %v52_v35  ;;  %v68_v50 = vshll.u32 %v779_v12, 16  ;;  %v74_v51 = vshll.u32 %v788_v16, 16  ;;  %s689_s15 = scalar_lea.vmem %s585_s14, 32  ;;  %p694_p1 = scmp.lt.s32.totalorder %s585_s14, %s585_s14 }
   0xe   :  { %650 = vmatpush3.bf16.msra.mxu0 %v355_v13  ;;  %v324_v52 = vrot.slane %v60_v33, 6  ;;  %v67_v53 = vrot.slane %v65_v46, 4  ;;  %v78_v54 = vshrl.u32 %v788_v16, 16  ;;  %v84_v55 = vshll.u32 %v793_v17, 16  ;;  %p690_p0 = scmp.ne.s32.totalorder %s585_s14, %s689_s15  ;;  %p695_p2 = scmp.lt.s32.totalorder %s689_s15, %s689_s15 }
   0xf   :  { %v53_v56 = vsel %vm822_vm7, %v48_v48, %v52_v35  ;;  %v58_v57 = vrot.slane %v57_v49, 4  ;;  %v70_v58 = vrot.slane %v68_v50, 5  ;;  %v76_v59 = vrot.slane %v74_v51, 5  ;;  %681 = vmatprep.subr.msk.bf16.mxu0 %vm101_vm0, %v830_v47 }
  0x10   :  { %v80_v60 = vrot.slane %v78_v54, 4  ;;  %v86_v61 = vrot.slane %v84_v55, 5  ;;  %v327_v62 = vrot.slane %v65_v46, 5  ;;  %v328_v63 = vrot.slane %v68_v50, 6  ;;  %p696_p3 = por %p695_p2, %p694_p1 }
  0x11   :  { %v63_v0 = vsel %vm822_vm7, %v58_v57, %v62_v43  ;;  %v71_v2 = vor.u32 %v70_v58, %v67_v53  ;;  %v332_v5 = vrot.slane %v74_v51, 6  ;;  %vm309_vm8 = vsmask.f32 2304 }
  0x12   :  { %v592_v6 = vcombine.low %v53_v56, %v63_v0  ;;  %v81_v7 = vor.u32 %v80_v60, %v76_v59  ;;  %vm310_vm9 = vsmask.f32 6416  ;;  %v314_v8 = vor.u32 %v313_v41, %v312_v36  ;;  %p697_p4 = pnand %p696_p3, %p690_p0 }
  0x13   :  { %v72_v9 = vrot.slane %v71_v2, 4  ;;  %v339_v11 = vrot.slane %v84_v55, 6  ;;  %vm843_vm10 = vmor %vm309_vm8, %vm310_vm9  ;;  %v318_v14 = vor.u32 %v317_v45, %v316_v44  ;;  %v323_v15 = vrot.slane %v321_v10, 5 }
  0x14   :  { %633 = vmatprep.mubr.msk.bf16.mxu1 %vm94_vm1, %v592_v6  ;;  %v82_v18 = vrot.slane %v81_v7, 4  ;;  %v315_v19 = vrot.slane %v314_v8, 4  ;;  %v329_v20 = vor.u32 %v328_v63, %v327_v62  ;;  %v331_v21 = vrot.slane %v78_v54, 5 }
  0x15   :  { %v77_v22 = vsel %vm822_vm7, %v72_v9, %v76_v59  ;;  %v320_v23 = vrot.slane %v318_v14, 4  ;;  %v325_v24 = vor.u32 %v324_v52, %v323_v15  ;;  %v336_v26 = vshrl.u32 %v793_v17, 16 }
  0x16   :  { %v87_v27 = vsel %vm822_vm7, %v82_v18, %v86_v61  ;;  %v319_v28 = vsel %vm843_vm10, %v315_v19, %v318_v14  ;;  %v330_v10 = vrot.slane %v329_v20, 4  ;;  %v333_v29 = vor.u32 %v332_v5, %v331_v21 }
  0x17   :  { %v593_v30 = vcombine.low %v77_v22, %v87_v27  ;;  %v326_v31 = vsel %vm843_vm10, %v320_v23, %v325_v24  ;;  %v171_v32 = vsel %vm101_vm0, %v806_v25, 0  ;;  %v338_v33 = vrot.slane %v336_v26, 5 }
  0x18   :  { %v606_v34 = vcombine.low %v319_v28, %v326_v31  ;;  %v334_v35 = vsel %vm843_vm10, %v330_v10, %v333_v29  ;;  %v335_v36 = vrot.slane %v333_v29, 4  ;;  %vm411_vm11 = vcmask 1045508  }
  0x19   :  { %634 = vmatmul.mubr.msk.bf16.vlgmr.msra.gmra.mrb[0].mxu1 %vm94_vm1, %v593_v30  ;;  %v340_v38 = vor.u32 %v339_v11, %v338_v33  ;;  %v610_v39 = vrot.slane %v747_v1, 10  ;;  %v415_v40 = vrot.slane %v754_v3, 6  ;;  %vm868_vm12 = vmor %vm101_vm0, %vm411_vm11  ;;  %v418_v41 = vrot.slane %v759_v4, 6 }
  0x1a   :  { %651 = vmatprep.mubr.msk.bf16.mxu0 %vm94_vm1, %v606_v34  ;;  %638 = vmatpush3.bf16.msra.mxu1 %v171_v32  ;;  %v422_v45 = vrot.slane %v788_v16, 6  ;;  %v440_v48 = vsel %vm101_vm0, %v830_v47, 0  ;;  %v611_v1 = vrot.slane %v779_v12, 10  ;;  %v597_v50 = vcombine.low %v779_v12, %v788_v16 }
  0x1b   :  { %v341_v42 = vsel %vm843_vm10, %v335_v36, %v340_v38  ;;  %639 = vmatprep.mubr.msk.bf16.mxu1 %vm94_vm1, %v596_v37  ;;  %v416_v43 = vsel %vm868_vm12, %v610_v39, %v415_v40  ;;  %v417_v44 = vrot.slane %v415_v40, 4  ;;  %v425_v37 = vrot.slane %v793_v17, 6 }
  0x1c   :  { %v607_v46 = vcombine.low %v334_v35, %v341_v42  ;;  %v424_v3 = vrot.slane %v422_v45, 4  ;;  %v423_v47 = vsel %vm868_vm12, %v611_v1, %v422_v45  ;;  %v713_v53 = vmov -inf  }
  0x1d   :  { %v419_v4 = vsel %vm868_vm12, %v417_v44, %v418_v41  ;;  %25 = vst [vmem:[#allocation4] sm:$0x3] %v713_v53  ;;  %v714_v54 = vmov 0.0   ;;  %vm540_vm13 = vcmask 1041409  }
  0x1e   :  { %652 = vmatmul.mubr.msk.bf16.vlgmr.msra.gmra.mrb[0].mxu0 %vm94_vm1, %v607_v46  ;;  %v612_v49 = vcombine.low %v416_v43, %v419_v4  ;;  %v426_v51 = vsel %vm868_vm12, %v424_v3, %v425_v37  ;;  %23 = vst [vmem:[#allocation2] sm:$0x1] %v714_v54  ;;  %24 = vst [vmem:[#allocation3] sm:$0x1] %v714_v54  ;;  %v564_v54 = vlaneseq }
  0x1f   :  { %656 = vmatpush3.bf16.msra.mxu0 %v440_v48  ;;  %v613_v52 = vcombine.low %v423_v47, %v426_v51 }
  0x20   :  { %657 = vmatprep.mubr.msk.bf16.mxu0 %vm94_vm1, %v612_v49 }
  0x24   :  { %v523_v38 = vld [vmem:[#allocation4] sm:$0x3] }
  0x25   :  { %640 = vmatmul.mubr.msk.bf16.vlgmr.msra.gmra.mrb[0].mxu1 %vm94_vm1, %v597_v50  ;;  %v495_v42 = vld [vmem:[#allocation2] sm:$0x1]  ;;  %v507_v46 = vld [vmem:[#allocation3] sm:$0x1] }
  0x2a   :  { %658 = vmatmul.mubr.msk.bf16.vlgmr.msra.gmra.mrb[0].mxu0 %vm94_vm1, %v613_v52 }
  0xf8   :  { %v641_v17 = vpop.f32.mrb[0].mxu1 }
  0xf9   :  { %v207_v55 = vpop.f32.mrb[1].mxu1 }
  0xfa   :  { %v642_v56 = vpop.f32.mrb[2].mxu1 }
  0xfb   :  { %v210_v12 = vpop.f32.mrb[3].mxu1 }
  0xfd   :  { %v659_v16 = vpop.f32.mrb[0].mxu0 }
  0xfe   :  { %v661_v57 = vadd.f32 %v659_v16, %v641_v17  ;;  %v476_v58 = vpop.f32.mrb[1].mxu0  ;;  %v565_v17 = vshrl.u32 %v564_v54, 7 }
  0xff   :  { %v662_v59 = vadd.f32 %v476_v58, %v207_v55  ;;  %v660_v60 = vpop.f32.mrb[2].mxu0  ;;  %v555_v55 = vld [vmem:[%s918_s2] sm:$0x1] }
 0x100   :  { %v663_v61 = vadd.f32 %v660_v60, %v642_v56  ;;  %v479_v62 = vpop.f32.mrb[3].mxu0  ;;  %v510_v9 = vmul.f32 %v661_v57, %v661_v57  ;;  %v566_v56 = vsub.s32 0, %v565_v17 }
 0x101   :  { %v664_v63 = vadd.f32 %v479_v62, %v210_v12  ;;  %v508_v2 = vmul.f32 %v662_v59, %v662_v59 }
 0x102   :  { %v531_v0 = vmax.f32 %v661_v57, %v663_v61  ;;  %v511_v18 = vmul.f32 %v663_v61, %v663_v61 }
 0x103   :  { %v496_v5 = vadd.f32 %v664_v63, %v662_v59  ;;  %v509_v6 = vmul.f32 %v664_v63, %v664_v63  ;;  %v524_v7 = vmax.f32 %v662_v59, %v664_v63 }
 0x104   :  { %v532_v8 = vrot.slane %v531_v0, 4 }
 0x105   :  { %v497_v11 = vadd.f32 %v661_v57, %v496_v5  ;;  %v512_v13 = vadd.f32 %v509_v6, %v508_v2  ;;  %v525_v14 = vrot.slane %v524_v7, 4  ;;  %v559_v57 = vld [vmem:[%s919_s3] sm:$0x1] }
 0x106   :  { %v533_v15 = vmax.f32 %v531_v0, %v532_v8 }
 0x107   :  { %v498_v19 = vadd.f32 %v663_v61, %v497_v11  ;;  %v513_v20 = vadd.f32 %v512_v13, %v510_v9  ;;  %v526_v21 = vmax.f32 %v524_v7, %v525_v14 }
 0x108   :  { %v534_v22 = vrot.slane %v533_v15, 2 }
 0x109   :  { %v499_v23 = vrot.slane %v498_v19, 4  ;;  %v514_v24 = vadd.f32 %v513_v20, %v511_v18  ;;  %v527_v26 = vrot.slane %v526_v21, 2 }
 0x10a   :  { %v535_v27 = vmax.f32 %v533_v15, %v534_v22 }
 0x10b   :  { %v500_v28 = vadd.f32 %v499_v23, %v498_v19  ;;  %v515_v10 = vrot.slane %v514_v24, 4  ;;  %v528_v29 = vmax.f32 %v526_v21, %v527_v26 }
 0x10c   :  { %v536_v30 = vrot.slane %v535_v27, 1 }
 0x10d   :  { %v501_v31 = vrot.slane %v500_v28, 2  ;;  %v516_v32 = vadd.f32 %v515_v10, %v514_v24  ;;  %v529_v33 = vrot.slane %v528_v29, 1 }
 0x10e   :  { %v537_v34 = vmax.f32 %v535_v27, %v536_v30 }
 0x10f   :  { %v502_v35 = vadd.f32 %v501_v31, %v500_v28  ;;  %v517_v36 = vrot.slane %v516_v32, 2  ;;  %v530_v39 = vmax.f32 %v528_v29, %v529_v33 }
 0x111   :  { %v503_v40 = vrot.slane %v502_v35, 1  ;;  %v518_v25 = vadd.f32 %v517_v36, %v516_v32  ;;  %v541_v41 = vsel %vm540_vm13, %v537_v34, %v530_v39 }
 0x112   :  { %v543_v43 = vmax.f32 %v523_v38, %v541_v41 }
 0x113   :  { %v504_v44 = vadd.f32 %v503_v40, %v502_v35  ;;  %v519_v45 = vrot.slane %v518_v25, 1 }
 0x114   :  { %544 = vst [vmem:[#allocation4] sm:$0x3] %v543_v43 }
 0x115   :  { %v505_v48 = vadd.f32 %v504_v44, %v495_v42  ;;  %v520_v4 = vadd.f32 %v519_v45, %v518_v25 }
 0x117   :  { %506 = vst [vmem:[#allocation2] sm:$0x1] %v505_v48  ;;  %v521_v49 = vadd.f32 %v520_v4, %v507_v46 }
 0x119   :  { %522 = vst [vmem:[#allocation3] sm:$0x1] %v521_v49 }
 0x11b   :  { %v562_v61 = vld [vmem:[#allocation4] sm:$0x3] }
 0x11e   :  { %v548_v1 = vld [vmem:[#allocation2] sm:$0x1] }
 0x11f   :  { %v549_v3 = vmul.f32 0.03125, %v548_v1 }
 0x120   :  { %v550_v37 = vld [vmem:[#allocation3] sm:$0x1] }
 0x121   :  { %v551_v50 = vmul.f32 0.03125, %v550_v37  ;;  %v552_v47 = vmul.f32 %v549_v3, %v549_v3 }
 0x123   :  { %v553_v51 = vsub.f32 %v551_v50, %v552_v47 }
 0x125   :  { %v554_v52 = vmax.f32 %v553_v51, 0.0 }
 0x127   :  { %v556_v53 = vadd.f32 1e-05, %v554_v52 }
 0x129   :  { %687 = vrsqrt.f32 %v556_v53 }
 0x133   :  { %v688_v12 = vpop.eup %687 }
 0x134   :  { %v558_v16 = vmul.f32 %v688_v12, %v555_v55 }
 0x136   :  { %v560_v58 = vmul.f32 %v558_v16, %v549_v3  ;;  %v567_v59 = vrot.slane %v558_v16, %v566_v56 }
 0x138   :  { %v561_v60 = vsub.f32 %v559_v57, %v560_v58  ;;  %v569_v62 = vmul.f32 %v567_v59, %v562_v61 }
 0x13a   :  { %v574_v63 = vrot.slane %v561_v60, %v566_v56 }
 0x13c   :  { %v576_v0 = vadd.f32 %v574_v63, %v569_v62 }
 0x13e   :  { %577 = vst [vmem:[#allocation5] sm:$0x3] %v576_v0 }
 0x13f   :  { %700 = shalt.err (!%p697_p4)
}
 0x140   :  { %s701_s16 = scalar_lea.hbm %s920_s4, 32 }
 0x141   :  { %p702_p5 = scmp.ne.s32.totalorder %s920_s4, %s701_s16  ;;  %p705_p6 = scmp.lt.u32.totalorder %s701_s16, %s920_s4 }
 0x143   :  { %p707_p7 = pnand %p705_p6, %p702_p5 }
 0x145   :  { %710 = shalt.err (!%p707_p7)
}
 0x146   :  { %587 = dma.vmem_to_hbm [thread:$0]  %s585_s14, 32, %s920_s4, [#allocation6]  }
 0x147   :  { %711 = dma.done.wait [#allocation6], 32  }
 0x148   :  { %712 = vsyncadd [#allocation6], 4294967264 }
 0x149   :  { %591 = vsyncpa [#allocation6], 1 }

</bundles_post_ra>
